<compile_context>
chip_gen: v6e
topology: v6e:2x2x1
jax: 0.10.0
libtpu: 0.0.40
codegen_flags: <defaults>
</compile_context>

<pallas_src>
import functools

import jax
import jax.numpy as jnp
from jax.experimental import pallas as pl
from jax.experimental.pallas import tpu as pltpu

EPS = 1e-5


def _encoding_block_kernel(x_ref, r1_ref, g1_ref, b1_ref, r2_ref, g2_ref, b2_ref,
                           m2_ref, out_ref, xpad_ref, ypad_ref, *, nhw):
    """Fused double (conv3x3 -> BN -> ReLU) block in a lane-dense packed layout.

    x_ref   : (N, H, W*Cin)         input rows packed as (w, ci) along lanes
    r1_ref  : (3*W*Cin,  W*Cout)    banded conv1 weights, dy slabs stacked along K
    r2_ref  : (3*W*Cout, W*Cout)    banded conv2 weights
    g*_ref  : (1, W*Cout)           BN gamma / beta pre-tiled per packed column
    m2_ref  : (W*Cout, W*Cout)      0/1 "same channel" mask
    out_ref : (N, H, W*Cout)        lane-dense output (128 lanes at the test size)
    xpad_ref: (N, H+2, W*Cin)       scratch: H-padded packed input
    ypad_ref: (N, H+2, W*Cout)      scratch: H-padded packed intermediate
    """
    N, H, WCin = x_ref.shape
    WCout = out_ref.shape[-1]
    NH = N * H
    inv_nhw = jnp.float32(1.0 / nhw)
    m2 = m2_ref[...]

    def conv_bn_relu(pad_ref, band, k_in, gamma_cols, beta_cols):
        # ---- 3x3 conv (stride 1, pad 1) as ONE matmul: lane-dim concat of the three
        #      dy-shifted slabs (single materialization) -> (NH, 3*K) x (3*K, WCout) ------
        lhs = jnp.concatenate([pad_ref[:, dy:dy + H, :] for dy in range(3)],
                              axis=-1).reshape(NH, 3 * k_in)
        acc = jnp.dot(lhs, band, preferred_element_type=jnp.float32)    # (NH, WCout)

        # ---- training-mode BN over (N, H, W) per channel, biased variance ---------------
        # Reduce over NH rows first (exact f32, VPU/XLU), then the tiny same-channel mask
        # matmul does per-channel reduce + broadcast across the packed (w, c) lane dim.
        row_sum = jnp.sum(acc, axis=0, keepdims=True)                   # (1, WCout)
        mean_cols = jnp.dot(row_sum, m2,
                            preferred_element_type=jnp.float32) * inv_nhw
        diff = acc - mean_cols
        sq_sum = jnp.sum(diff * diff, axis=0, keepdims=True)            # (1, WCout)
        var_cols = jnp.dot(sq_sum, m2,
                           preferred_element_type=jnp.float32) * inv_nhw
        scale_cols = gamma_cols * jax.lax.rsqrt(var_cols + EPS)
        shift_cols = beta_cols - mean_cols * scale_cols
        return jnp.maximum(acc * scale_cols + shift_cols, 0.0)          # (NH, WCout)

    # ---- stage the H-padded input (zero only the two border rows; W pad is in weights) ---
    xpad_ref[:, 0:1, :] = jnp.zeros((N, 1, WCin), jnp.float32)
    xpad_ref[:, H + 1:H + 2, :] = jnp.zeros((N, 1, WCin), jnp.float32)
    xpad_ref[:, 1:H + 1, :] = x_ref[...]

    y1 = conv_bn_relu(xpad_ref, r1_ref[...], WCin, g1_ref[...], b1_ref[...])

    # ---- stage the H-padded intermediate for conv2 ----------------------------------------
    ypad_ref[:, 0:1, :] = jnp.zeros((N, 1, WCout), jnp.float32)
    ypad_ref[:, H + 1:H + 2, :] = jnp.zeros((N, 1, WCout), jnp.float32)
    ypad_ref[:, 1:H + 1, :] = y1.reshape(N, H, WCout)

    y2 = conv_bn_relu(ypad_ref, r2_ref[...], WCout, g2_ref[...], b2_ref[...])

    out_ref[...] = y2.reshape(N, H, WCout)                               # dense 128-lane store


def _band_weights(w_oihw, W):
    """(Cout, Cin, 3, 3) conv kernel -> (3*W*Cin, W*Cout) banded matrix (dy stacked along K).

    band[dy*W*Cin + w_in*Cin + ci, w*Cout + co] = w[co, ci, dy, w_in - w + 1]
    (0 if |w_in - w| > 1).  Missing off-band entries at w = 0 / W-1 implement the
    W-direction zero padding.
    """
    Cout, Cin = w_oihw.shape[0], w_oihw.shape[1]
    wt = jnp.transpose(w_oihw, (2, 3, 1, 0))                 # (dy, dx, Cin, Cout)
    bands = []
    for dy in range(3):
        m = jnp.zeros((W, Cin, W, Cout), w_oihw.dtype)
        for dx in range(3):
            diag = jnp.eye(W, k=1 - dx, dtype=w_oihw.dtype)  # diag[w_in, w]=1 iff w_in==w+dx-1
            m = m + diag[:, None, :, None] * wt[dy, dx][None, :, None, :]
        bands.append(m.reshape(W * Cin, W * Cout))
    return jnp.concatenate(bands, axis=0)                     # (3*W*Cin, W*Cout)


def encoding_block_forward(x_nchw, w1, g1, b1, w2, g2, b2):
    """x_nchw: (N, Cin, H, W) f32; w1: (Cout, Cin, 3, 3); w2: (Cout, Cout, 3, 3)."""
    N, Cin, H, W = x_nchw.shape
    Cout = w1.shape[0]
    WCin, WCout = W * Cin, W * Cout

    # NCHW -> NHWC -> pack (w, c) along the lane dim (W*Cout = 128 at the test size).
    x = jnp.transpose(x_nchw, (0, 2, 3, 1)).reshape(N, H, WCin)
    r1 = _band_weights(w1, W)                                 # (3*W*Cin,  W*Cout)
    r2 = _band_weights(w2, W)                                 # (3*W*Cout, W*Cout)
    g1c = jnp.tile(g1, W).reshape(1, WCout)                   # per-packed-column gamma/beta
    b1c = jnp.tile(b1, W).reshape(1, WCout)
    g2c = jnp.tile(g2, W).reshape(1, WCout)
    b2c = jnp.tile(b2, W).reshape(1, WCout)
    cidx = jnp.arange(WCout, dtype=jnp.int32) % Cout
    m2 = (cidx[:, None] == cidx[None, :]).astype(jnp.float32)  # same-channel mask (WCout, WCout)

    vmem = pl.BlockSpec(memory_space=pltpu.MemorySpace.VMEM)
    out = pl.pallas_call(
        functools.partial(_encoding_block_kernel, nhw=N * H * W),
        out_shape=jax.ShapeDtypeStruct((N, H, WCout), jnp.float32),
        in_specs=[vmem] * 8,
        out_specs=vmem,
        scratch_shapes=[pltpu.VMEM((N, H + 2, WCin), jnp.float32),
                        pltpu.VMEM((N, H + 2, WCout), jnp.float32)],
        # TODO(synk): at production sizes use grid=(N, H//band) with halo index_maps,
        #             dimension_semantics=("parallel", "arbitrary"), two-phase BN, and
        #             vmem_limit_bytes sized from the banded-weight footprint (v7x: 64 MiB).
    )(x, r1, g1c, b1c, r2, g2c, b2c, m2)

    return jnp.transpose(out.reshape(N, H, W, Cout), (0, 3, 1, 2))  # back to NCHW


# ------------------------- pure-JAX reference (for correctness check) -----------------------
def _ref_forward(x, w1, g1, b1, w2, g2, b2):
    def conv(x, w):
        return jax.lax.conv_general_dilated(
            x, w, window_strides=(1, 1), padding=((1, 1), (1, 1)),
            dimension_numbers=("NCHW", "OIHW", "NCHW"))

    def bn_relu(x, g, b):
        mean = jnp.mean(x, axis=(0, 2, 3), keepdims=True)
        var = jnp.mean((x - mean) ** 2, axis=(0, 2, 3), keepdims=True)
        y = (x - mean) * jax.lax.rsqrt(var + EPS) * g.reshape(1, -1, 1, 1) + b.reshape(1, -1, 1, 1)
        return jnp.maximum(y, 0.0)

    y = bn_relu(conv(x, w1), g1, b1)
    return bn_relu(conv(y, w2), g2, b2)


if __name__ == "__main__":
    N, Cin, Cout, H, W = 2, 4, 8, 16, 16

    key = jax.random.PRNGKey(0)
    kx, k1, k2, kg1, kb1, kg2, kb2 = jax.random.split(key, 7)

    x = jax.random.normal(kx, (N, Cin, H, W), jnp.float32)
    w1 = jax.random.normal(k1, (Cout, Cin, 3, 3), jnp.float32) * 0.2   # conv1 weight (no bias)
    w2 = jax.random.normal(k2, (Cout, Cout, 3, 3), jnp.float32) * 0.2  # conv2 weight (no bias)
    g1 = 1.0 + 0.1 * jax.random.normal(kg1, (Cout,), jnp.float32)      # BN1 gamma
    b1 = 0.1 * jax.random.normal(kb1, (Cout,), jnp.float32)            # BN1 beta
    g2 = 1.0 + 0.1 * jax.random.normal(kg2, (Cout,), jnp.float32)      # BN2 gamma
    b2 = 0.1 * jax.random.normal(kb2, (Cout,), jnp.float32)            # BN2 beta

    out = jax.block_until_ready(encoding_block_forward(x, w1, g1, b1, w2, g2, b2))
    ref = jax.block_until_ready(_ref_forward(x, w1, g1, b1, w2, g2, b2))

    assert out.shape == (N, Cout, H, W)
    max_err = float(jnp.max(jnp.abs(out - ref)))
    assert jnp.allclose(out, ref, atol=2e-4, rtol=2e-4), max_err
    print("KERNEL_OK")
</pallas_src>

<mosaic_0001>
module attributes {stable_mosaic.version = 11 : i64} {
  func.func @_encoding_block_kernel(%arg0: memref<2x16x64xf32, #tpu.memory_space<vmem>>, %arg1: memref<192x128xf32, #tpu.memory_space<vmem>>, %arg2: memref<1x128xf32, #tpu.memory_space<vmem>>, %arg3: memref<1x128xf32, #tpu.memory_space<vmem>>, %arg4: memref<384x128xf32, #tpu.memory_space<vmem>>, %arg5: memref<1x128xf32, #tpu.memory_space<vmem>>, %arg6: memref<1x128xf32, #tpu.memory_space<vmem>>, %arg7: memref<128x128xf32, #tpu.memory_space<vmem>>, %arg8: memref<2x16x128xf32, #tpu.memory_space<vmem>>, %arg9: memref<2x18x64xf32, #tpu.memory_space<vmem>>, %arg10: memref<2x18x128xf32, #tpu.memory_space<vmem>>) attributes {dimension_semantics = [], scalar_prefetch = 0 : i64, scratch_operands = 2 : i64, tpu.core_type = #tpu.core_type<tc>} {
    %c0 = arith.constant 0 : index
    %c0_0 = arith.constant 0 : index
    %0 = vector.load %arg7[%c0, %c0_0] : memref<128x128xf32, #tpu.memory_space<vmem>>, vector<128x128xf32>
    %cst = arith.constant 0.000000e+00 : f32
    %1 = vector.broadcast %cst : f32 to vector<2x1x64xf32>
    %c0_1 = arith.constant 0 : index
    %c0_2 = arith.constant 0 : index
    %c0_3 = arith.constant 0 : index
    %2 = vector.load %arg9[%c0_1, %c0_2, %c0_3] : memref<2x18x64xf32, #tpu.memory_space<vmem>>, vector<2x1x64xf32>
    tpu.vector_store %arg9[%c0_1, %c0_2, %c0_3], %1 {strides = array<i32>} : memref<2x18x64xf32, #tpu.memory_space<vmem>>, vector<2x1x64xf32>,
    %cst_4 = arith.constant 0.000000e+00 : f32
    %3 = vector.broadcast %cst_4 : f32 to vector<2x1x64xf32>
    %c0_5 = arith.constant 0 : index
    %c17 = arith.constant 17 : index
    %c0_6 = arith.constant 0 : index
    %4 = vector.load %arg9[%c0_5, %c17, %c0_6] : memref<2x18x64xf32, #tpu.memory_space<vmem>>, vector<2x1x64xf32>
    tpu.vector_store %arg9[%c0_5, %c17, %c0_6], %3 {strides = array<i32>} : memref<2x18x64xf32, #tpu.memory_space<vmem>>, vector<2x1x64xf32>,
    %c0_7 = arith.constant 0 : index
    %c0_8 = arith.constant 0 : index
    %c0_9 = arith.constant 0 : index
    %5 = vector.load %arg0[%c0_7, %c0_8, %c0_9] : memref<2x16x64xf32, #tpu.memory_space<vmem>>, vector<2x16x64xf32>
    %c0_10 = arith.constant 0 : index
    %c1 = arith.constant 1 : index
    %c0_11 = arith.constant 0 : index
    %6 = vector.load %arg9[%c0_10, %c1, %c0_11] : memref<2x18x64xf32, #tpu.memory_space<vmem>>, vector<2x16x64xf32>
    tpu.vector_store %arg9[%c0_10, %c1, %c0_11], %5 {strides = array<i32>} : memref<2x18x64xf32, #tpu.memory_space<vmem>>, vector<2x16x64xf32>,
    %c0_12 = arith.constant 0 : index
    %c0_13 = arith.constant 0 : index
    %7 = vector.load %arg1[%c0_12, %c0_13] : memref<192x128xf32, #tpu.memory_space<vmem>>, vector<192x128xf32>
    %c0_14 = arith.constant 0 : index
    %c0_15 = arith.constant 0 : index
    %8 = vector.load %arg2[%c0_14, %c0_15] : memref<1x128xf32, #tpu.memory_space<vmem>>, vector<1x128xf32>
    %c0_16 = arith.constant 0 : index
    %c0_17 = arith.constant 0 : index
    %9 = vector.load %arg3[%c0_16, %c0_17] : memref<1x128xf32, #tpu.memory_space<vmem>>, vector<1x128xf32>
    %c0_18 = arith.constant 0 : index
    %c0_19 = arith.constant 0 : index
    %c0_20 = arith.constant 0 : index
    %10 = vector.load %arg9[%c0_18, %c0_19, %c0_20] : memref<2x18x64xf32, #tpu.memory_space<vmem>>, vector<2x16x64xf32>
    %c0_21 = arith.constant 0 : index
    %c1_22 = arith.constant 1 : index
    %c0_23 = arith.constant 0 : index
    %11 = vector.load %arg9[%c0_21, %c1_22, %c0_23] : memref<2x18x64xf32, #tpu.memory_space<vmem>>, vector<2x16x64xf32>
    %c0_24 = arith.constant 0 : index
    %c2 = arith.constant 2 : index
    %c0_25 = arith.constant 0 : index
    %12 = vector.load %arg9[%c0_24, %c2, %c0_25] : memref<2x18x64xf32, #tpu.memory_space<vmem>>, vector<2x16x64xf32>
    %13 = tpu.concatenate %10, %11, %12 in 2 : vector<2x16x64xf32>, vector<2x16x64xf32>, vector<2x16x64xf32> -> vector<2x16x192xf32>
    %14 = vector.shape_cast %13 : vector<2x16x192xf32> to vector<32x192xf32>
    %cst_26 = arith.constant dense<0.000000e+00> : vector<32x128xf32>
    %15 = tpu.matmul %14, %7, %cst_26 {dimension_numbers = #tpu.dot_dimension_numbers<[1], [0], [0], [1], [0, 0, 1, 1], [], []>} : vector<32x192xf32>, vector<192x128xf32>, vector<32x128xf32> -> vector<32x128xf32>
    %cst_27 = arith.constant dense<0.000000e+00> : vector<128xf32>
    %16 = vector.multi_reduction <add>, %15, %cst_27 [0] : vector<32x128xf32> to vector<128xf32>
    %17 = vector.shape_cast %16 : vector<128xf32> to vector<1x128xf32>
    %cst_28 = arith.constant dense<0.000000e+00> : vector<1x128xf32>
    %18 = tpu.matmul %17, %0, %cst_28 {dimension_numbers = #tpu.dot_dimension_numbers<[1], [0], [0], [1], [0, 0, 1, 1], [], []>} : vector<1x128xf32>, vector<128x128xf32>, vector<1x128xf32> -> vector<1x128xf32>
    %cst_29 = arith.constant 0.001953125 : f32
    %19 = vector.broadcast %cst_29 : f32 to vector<1x128xf32>
    %20 = arith.mulf %18, %19 : vector<1x128xf32>
    %21 = vector.broadcast %20 : vector<1x128xf32> to vector<32x128xf32>
    %22 = arith.subf %15, %21 : vector<32x128xf32>
    %23 = arith.mulf %22, %22 : vector<32x128xf32>
    %cst_30 = arith.constant dense<0.000000e+00> : vector<128xf32>
    %24 = vector.multi_reduction <add>, %23, %cst_30 [0] : vector<32x128xf32> to vector<128xf32>
    %25 = vector.shape_cast %24 : vector<128xf32> to vector<1x128xf32>
    %cst_31 = arith.constant dense<0.000000e+00> : vector<1x128xf32>
    %26 = tpu.matmul %25, %0, %cst_31 {dimension_numbers = #tpu.dot_dimension_numbers<[1], [0], [0], [1], [0, 0, 1, 1], [], []>} : vector<1x128xf32>, vector<128x128xf32>, vector<1x128xf32> -> vector<1x128xf32>
    %cst_32 = arith.constant 0.001953125 : f32
    %27 = vector.broadcast %cst_32 : f32 to vector<1x128xf32>
    %28 = arith.mulf %26, %27 : vector<1x128xf32>
    %cst_33 = arith.constant 9.99999974E-6 : f32
    %29 = vector.broadcast %cst_33 : f32 to vector<1x128xf32>
    %30 = arith.addf %28, %29 : vector<1x128xf32>
    %31 = math.rsqrt %30 : vector<1x128xf32>
    %32 = arith.mulf %8, %31 : vector<1x128xf32>
    %33 = arith.mulf %20, %32 : vector<1x128xf32>
    %34 = arith.subf %9, %33 : vector<1x128xf32>
    %35 = vector.broadcast %32 : vector<1x128xf32> to vector<32x128xf32>
    %36 = arith.mulf %15, %35 : vector<32x128xf32>
    %37 = vector.broadcast %34 : vector<1x128xf32> to vector<32x128xf32>
    %38 = arith.addf %36, %37 : vector<32x128xf32>
    %cst_34 = arith.constant 0.000000e+00 : f32
    %39 = vector.broadcast %cst_34 : f32 to vector<32x128xf32>
    %40 = arith.maximumf %38, %39 : vector<32x128xf32>
    %cst_35 = arith.constant 0.000000e+00 : f32
    %41 = vector.broadcast %cst_35 : f32 to vector<2x1x128xf32>
    %c0_36 = arith.constant 0 : index
    %c0_37 = arith.constant 0 : index
    %c0_38 = arith.constant 0 : index
    %42 = vector.load %arg10[%c0_36, %c0_37, %c0_38] : memref<2x18x128xf32, #tpu.memory_space<vmem>>, vector<2x1x128xf32>
    tpu.vector_store %arg10[%c0_36, %c0_37, %c0_38], %41 {strides = array<i32>} : memref<2x18x128xf32, #tpu.memory_space<vmem>>, vector<2x1x128xf32>,
    %cst_39 = arith.constant 0.000000e+00 : f32
    %43 = vector.broadcast %cst_39 : f32 to vector<2x1x128xf32>
    %c0_40 = arith.constant 0 : index
    %c17_41 = arith.constant 17 : index
    %c0_42 = arith.constant 0 : index
    %44 = vector.load %arg10[%c0_40, %c17_41, %c0_42] : memref<2x18x128xf32, #tpu.memory_space<vmem>>, vector<2x1x128xf32>
    tpu.vector_store %arg10[%c0_40, %c17_41, %c0_42], %43 {strides = array<i32>} : memref<2x18x128xf32, #tpu.memory_space<vmem>>, vector<2x1x128xf32>,
    %45 = vector.shape_cast %40 : vector<32x128xf32> to vector<2x16x128xf32>
    %c0_43 = arith.constant 0 : index
    %c1_44 = arith.constant 1 : index
    %c0_45 = arith.constant 0 : index
    %46 = vector.load %arg10[%c0_43, %c1_44, %c0_45] : memref<2x18x128xf32, #tpu.memory_space<vmem>>, vector<2x16x128xf32>
    tpu.vector_store %arg10[%c0_43, %c1_44, %c0_45], %45 {strides = array<i32>} : memref<2x18x128xf32, #tpu.memory_space<vmem>>, vector<2x16x128xf32>,
    %c0_46 = arith.constant 0 : index
    %c0_47 = arith.constant 0 : index
    %47 = vector.load %arg4[%c0_46, %c0_47] : memref<384x128xf32, #tpu.memory_space<vmem>>, vector<384x128xf32>
    %c0_48 = arith.constant 0 : index
    %c0_49 = arith.constant 0 : index
    %48 = vector.load %arg5[%c0_48, %c0_49] : memref<1x128xf32, #tpu.memory_space<vmem>>, vector<1x128xf32>
    %c0_50 = arith.constant 0 : index
    %c0_51 = arith.constant 0 : index
    %49 = vector.load %arg6[%c0_50, %c0_51] : memref<1x128xf32, #tpu.memory_space<vmem>>, vector<1x128xf32>
    %c0_52 = arith.constant 0 : index
    %c0_53 = arith.constant 0 : index
    %c0_54 = arith.constant 0 : index
    %50 = vector.load %arg10[%c0_52, %c0_53, %c0_54] : memref<2x18x128xf32, #tpu.memory_space<vmem>>, vector<2x16x128xf32>
    %c0_55 = arith.constant 0 : index
    %c1_56 = arith.constant 1 : index
    %c0_57 = arith.constant 0 : index
    %51 = vector.load %arg10[%c0_55, %c1_56, %c0_57] : memref<2x18x128xf32, #tpu.memory_space<vmem>>, vector<2x16x128xf32>
    %c0_58 = arith.constant 0 : index
    %c2_59 = arith.constant 2 : index
    %c0_60 = arith.constant 0 : index
    %52 = vector.load %arg10[%c0_58, %c2_59, %c0_60] : memref<2x18x128xf32, #tpu.memory_space<vmem>>, vector<2x16x128xf32>
    %53 = tpu.concatenate %50, %51, %52 in 2 : vector<2x16x128xf32>, vector<2x16x128xf32>, vector<2x16x128xf32> -> vector<2x16x384xf32>
    %54 = vector.shape_cast %53 : vector<2x16x384xf32> to vector<32x384xf32>
    %cst_61 = arith.constant dense<0.000000e+00> : vector<32x128xf32>
    %55 = tpu.matmul %54, %47, %cst_61 {dimension_numbers = #tpu.dot_dimension_numbers<[1], [0], [0], [1], [0, 0, 1, 1], [], []>} : vector<32x384xf32>, vector<384x128xf32>, vector<32x128xf32> -> vector<32x128xf32>
    %cst_62 = arith.constant dense<0.000000e+00> : vector<128xf32>
    %56 = vector.multi_reduction <add>, %55, %cst_62 [0] : vector<32x128xf32> to vector<128xf32>
    %57 = vector.shape_cast %56 : vector<128xf32> to vector<1x128xf32>
    %cst_63 = arith.constant dense<0.000000e+00> : vector<1x128xf32>
    %58 = tpu.matmul %57, %0, %cst_63 {dimension_numbers = #tpu.dot_dimension_numbers<[1], [0], [0], [1], [0, 0, 1, 1], [], []>} : vector<1x128xf32>, vector<128x128xf32>, vector<1x128xf32> -> vector<1x128xf32>
    %cst_64 = arith.constant 0.001953125 : f32
    %59 = vector.broadcast %cst_64 : f32 to vector<1x128xf32>
    %60 = arith.mulf %58, %59 : vector<1x128xf32>
    %61 = vector.broadcast %60 : vector<1x128xf32> to vector<32x128xf32>
    %62 = arith.subf %55, %61 : vector<32x128xf32>
    %63 = arith.mulf %62, %62 : vector<32x128xf32>
    %cst_65 = arith.constant dense<0.000000e+00> : vector<128xf32>
    %64 = vector.multi_reduction <add>, %63, %cst_65 [0] : vector<32x128xf32> to vector<128xf32>
    %65 = vector.shape_cast %64 : vector<128xf32> to vector<1x128xf32>
    %cst_66 = arith.constant dense<0.000000e+00> : vector<1x128xf32>
    %66 = tpu.matmul %65, %0, %cst_66 {dimension_numbers = #tpu.dot_dimension_numbers<[1], [0], [0], [1], [0, 0, 1, 1], [], []>} : vector<1x128xf32>, vector<128x128xf32>, vector<1x128xf32> -> vector<1x128xf32>
    %cst_67 = arith.constant 0.001953125 : f32
    %67 = vector.broadcast %cst_67 : f32 to vector<1x128xf32>
    %68 = arith.mulf %66, %67 : vector<1x128xf32>
    %cst_68 = arith.constant 9.99999974E-6 : f32
    %69 = vector.broadcast %cst_68 : f32 to vector<1x128xf32>
    %70 = arith.addf %68, %69 : vector<1x128xf32>
    %71 = math.rsqrt %70 : vector<1x128xf32>
    %72 = arith.mulf %48, %71 : vector<1x128xf32>
    %73 = arith.mulf %60, %72 : vector<1x128xf32>
    %74 = arith.subf %49, %73 : vector<1x128xf32>
    %75 = vector.broadcast %72 : vector<1x128xf32> to vector<32x128xf32>
    %76 = arith.mulf %55, %75 : vector<32x128xf32>
    %77 = vector.broadcast %74 : vector<1x128xf32> to vector<32x128xf32>
    %78 = arith.addf %76, %77 : vector<32x128xf32>
    %cst_69 = arith.constant 0.000000e+00 : f32
    %79 = vector.broadcast %cst_69 : f32 to vector<32x128xf32>
    %80 = arith.maximumf %78, %79 : vector<32x128xf32>
    %81 = vector.shape_cast %80 : vector<32x128xf32> to vector<2x16x128xf32>
    %c0_70 = arith.constant 0 : index
    %c0_71 = arith.constant 0 : index
    %c0_72 = arith.constant 0 : index
    %82 = vector.load %arg8[%c0_70, %c0_71, %c0_72] : memref<2x16x128xf32, #tpu.memory_space<vmem>>, vector<2x16x128xf32>
    tpu.vector_store %arg8[%c0_70, %c0_71, %c0_72], %81 {strides = array<i32>} : memref<2x16x128xf32, #tpu.memory_space<vmem>>, vector<2x16x128xf32>,
    return
  }
}

</mosaic_0001>

<bundles_post_ra>
// kernel: tpu_custom_call.1
= control target key start
LH: loop header
LB: loop body
LE: loop exit
PB: predicated region body
PF: predicated region fallthrough
CT: control target
= control target key end

     0   :  { %13 = vsyncpa [#allocation5], 0  ;;  %s1712_s0 = inlined_call_operand.hbm [shape: f32[2,16,64], index: 0, kind: input, shape index: {}]   ;;  %s1713_s1 = inlined_call_operand.hbm [shape: f32[192,128], index: 1, kind: input, shape index: {}]   ;;  %s1714_s2 = inlined_call_operand.vmem [shape: f32[1,128], index: 2, kind: input, shape index: {}]   ;;  %s1715_s3 = inlined_call_operand.vmem [shape: f32[1,128], index: 3, kind: input, shape index: {}]   ;;  %s1716_s4 = inlined_call_operand.hbm [shape: f32[384,128], index: 4, kind: input, shape index: {}]   ;;  %s1717_s5 = inlined_call_operand.vmem [shape: f32[1,128], index: 5, kind: input, shape index: {}]   ;;  %s1718_s6 = inlined_call_operand.vmem [shape: f32[1,128], index: 6, kind: input, shape index: {}]   ;;  %s1719_s7 = inlined_call_operand.hbm [shape: f32[128,128], index: 7, kind: input, shape index: {}]   ;;  %s1720_s8 = inlined_call_operand.hbm [shape: f32[2,16,128], index: 8, kind: output, shape index: {}]  }
   0x1   :  { %14 = vsyncpa [#allocation8], 0 }
   0x2   :  { %15 = vsyncpa [#allocation11], 0 }
   0x3   :  { %16 = vsyncpa [#allocation6], 0  ;;  %s1371_s27 = smov [#allocation7]   ;;  %s1372_s29 = smov [#allocation4]  }
   0x4   :  { %s34_s28 = sshll.u32 %s1371_s27, 4  ;;  %s22_s30 = sshll.u32 %s1372_s29, 4  ;;  %s35_s28 = int_to_ptr.vmem [resolvable:$true] %s34_s28  ;;  %s23_s30 = int_to_ptr.vmem [resolvable:$true] %s22_s30 }
   0x5   :  { %s1271_s9 = scalar_lea.vmem %s35_s28, 3072  ;;  %p1276_p1 = scmp.lt.s32.totalorder %s35_s28, %s35_s28 }
   0x6   :  { %p1272_p0 = scmp.ne.s32.totalorder %s35_s28, %s1271_s9  ;;  %p1277_p2 = scmp.lt.s32.totalorder %s1271_s9, %s1271_s9 }
   0x8   :  { %p1278_p3 = por %p1277_p2, %p1276_p1 }
   0xa   :  { %p1279_p4 = pnand %p1278_p3, %p1272_p0 }
   0xc   :  { %1282 = shalt.err (!%p1279_p4)
}
   0xd   :  { %s1373_s10 = smov 128   ;;  %s1374_s11 = smov 8  }
   0xe   :  { %40 = dma.hbm_to_vmem [thread:$0]  %s1713_s1, 3072, %s35_s28, [#allocation8], %s1373_s10, %s1373_s10, %s1374_s11  }
   0xf   :  { %s1291_s14 = scalar_lea.vmem %s23_s30, 512  ;;  %p1296_p6 = scmp.lt.s32.totalorder %s23_s30, %s23_s30 }
  0x10   :  { %p1292_p5 = scmp.ne.s32.totalorder %s23_s30, %s1291_s14  ;;  %p1297_p7 = scmp.lt.s32.totalorder %s1291_s14, %s1291_s14 }
  0x12   :  { %p1298_p8 = por %p1297_p7, %p1296_p6 }
  0x14   :  { %p1299_p9 = pnand %p1298_p8, %p1292_p5 }
  0x16   :  { %1302 = shalt.err (!%p1299_p9)
}
  0x17   :  { %28 = dma.hbm_to_vmem [thread:$0]  %s1712_s0, 512, %s23_s30, [#allocation5], %s1373_s10, %s1373_s10, %s1374_s11  }
  0x18   :  { %s1375_s17 = smov [#allocation9]   ;;  %s1376_s19 = smov [#allocation10]  }
  0x19   :  { %s50_s18 = sshll.u32 %s1375_s17, 4  ;;  %s66_s20 = sshll.u32 %s1376_s19, 4  ;;  %s51_s18 = int_to_ptr.vmem [resolvable:$true] %s50_s18  ;;  %s67_s20 = int_to_ptr.vmem [resolvable:$true] %s66_s20 }
  0x1a   :  { %s1311_s1 = scalar_lea.vmem %s51_s18, 6144  ;;  %p1316_p11 = scmp.lt.s32.totalorder %s51_s18, %s51_s18 }
  0x1b   :  { %p1312_p10 = scmp.ne.s32.totalorder %s51_s18, %s1311_s1  ;;  %p1317_p12 = scmp.lt.s32.totalorder %s1311_s1, %s1311_s1 }
  0x1d   :  { %p1318_p13 = por %p1317_p12, %p1316_p11 }
  0x1f   :  { %p1319_p0 = pnand %p1318_p13, %p1312_p10 }
  0x21   :  { %1322 = shalt.err (!%p1319_p0)
}
  0x22   :  { %56 = dma.hbm_to_vmem [thread:$0]  %s1716_s4, 6144, %s51_s18, [#allocation8], %s1373_s10, %s1373_s10, %s1374_s11  }
  0x23   :  { %s1331_s0 = scalar_lea.vmem %s67_s20, 2048  ;;  %p1336_p2 = scmp.lt.s32.totalorder %s67_s20, %s67_s20 }
  0x24   :  { %p1332_p1 = scmp.ne.s32.totalorder %s67_s20, %s1331_s0  ;;  %p1337_p3 = scmp.lt.s32.totalorder %s1331_s0, %s1331_s0 }
  0x26   :  { %p1338_p4 = por %p1337_p3, %p1336_p2 }
  0x28   :  { %p1339_p5 = pnand %p1338_p4, %p1332_p1 }
  0x2a   :  { %1342 = shalt.err (!%p1339_p5)
}
  0x2b   :  { %72 = dma.hbm_to_vmem [thread:$0]  %s1719_s7, 2048, %s67_s20, [#allocation11], %s1373_s10, %s1373_s10, %s1374_s11  }
  0x2c   :  { %1363 = dma.done.wait [#allocation5], 512  }
  0x2d   :  { %1364 = vsyncadd [#allocation5], 4294966784 }
  0x2e   :  { %1365 = dma.done.wait [#allocation8], 9216  }
  0x2f   :  { %1366 = vsyncadd [#allocation8], 4294958080 }
  0x30   :  { %1367 = dma.done.wait [#allocation11], 2048  }
  0x31   :  { %1368 = vsyncadd [#allocation11], 4294965248  ;;  %vm101_vm0 = vcmask 516096   ;;  %v1377_v0 = vmov 0.0   ;;  %vm110_vm1 = vcmask 523264   ;;  %v106_v1 = vld [vmem:[#allocation4] sm:$0xff] }
  0x32   :  { %185 = vmatprep.subr.mxu0 %v1377_v0  ;;  %471 = vst [vmem:[#allocation3] sm:$0x1] %v1377_v0  ;;  %472 = vst [vmem:[#allocation3 + $0x18] sm:$0x1] %v1377_v0  ;;  %1071 = vmatprep.subr.mxu1 %v1377_v0  ;;  %v107_v2 = vld [vmem:[#allocation4 + $0x8] sm:$0xff]  ;;  %v108_v3 = vld [vmem:[#allocation4 + $0x10] sm:$0xff] }
  0x33   :  { %473 = vst [vmem:[#allocation3 + $0x11] sm:$0x1] %v1377_v0  ;;  %474 = vst [vmem:[#allocation3 + $0x29] sm:$0x1] %v1377_v0  ;;  %v109_v4 = vld [vmem:[#allocation4 + $0x18] sm:$0xff]  ;;  %v129_v6 = vld [vmem:[#allocation7 + $0x70] sm:$0xff] }
  0x34   :  { %102 = vst.msk [vmem:[#allocation2] sm:$0x1] %vm101_vm0, %v1377_v0  ;;  %103 = vst.msk [vmem:[#allocation2 + $0x18] sm:$0x1] %vm101_vm0, %v1377_v0  ;;  %v130_v5 = vld [vmem:[#allocation7 + $0x78] sm:$0xff]  ;;  %v128_v7 = vld [vmem:[#allocation7 + $0x68] sm:$0xff] }
  0x35   :  { %104 = vst.msk [vmem:[#allocation2 + $0x11] sm:$0x1] %vm101_vm0, %v1377_v0  ;;  %105 = vst.msk [vmem:[#allocation2 + $0x29] sm:$0x1] %vm101_vm0, %v1377_v0  ;;  %186 = vmatpush1.msra.mxu0 %v130_v5  ;;  %v127_v8 = vld [vmem:[#allocation7 + $0x60] sm:$0xff]  ;;  %v126_v11 = vld [vmem:[#allocation7 + $0x58] sm:$0xff] }
  0x36   :  { %111 = vst.msk [vmem:[#allocation2 + $0x1] sm:$0xff] %vm110_vm1, %v106_v1  ;;  %112 = vst.msk [vmem:[#allocation2 + $0x9] sm:$0xff] %vm110_vm1, %v107_v2  ;;  %187 = vmatprep.subr.mxu0 %v1377_v0  ;;  %s1378_s4 = smov 64   ;;  %v125_v15 = vld [vmem:[#allocation7 + $0x50] sm:$0xff]  ;;  %v124_v16 = vld [vmem:[#allocation7 + $0x48] sm:$0xff]  ;;  %vm1379_vm2 = vmmov 0  }
  0x37   :  { %113 = vst.msk [vmem:[#allocation2 + $0x19] sm:$0xff] %vm110_vm1, %v108_v3  ;;  %114 = vst.msk [vmem:[#allocation2 + $0x21] sm:$0xff] %vm110_vm1, %v109_v4  ;;  %188 = vmatpush1.msra.mxu0 %v129_v6  ;;  %v1470_v17 = vld [vmem:[#allocation10 + $0x78] sm:$0xff]  ;;  %v1472_v18 = vld [vmem:[#allocation10 + $0x70] sm:$0xff]  ;;  %1103 = vmatprep.mubr.msk.f32.mxu1 %vm1379_vm2, %v1377_v0  ;;  %s1380_s30 = smov [#allocation12]  }
  0x38   :  { %189 = vmatprep.subr.mxu0 %v1377_v0  ;;  %1072 = vmatpush3.msra.mxu1 %v1470_v17  ;;  %v123_v19 = vld [vmem:[#allocation7 + $0x40] sm:$0xff]  ;;  %v122_v20 = vld [vmem:[#allocation7 + $0x38] sm:$0xff]  ;;  %v121_v21 = vld [vmem:[#allocation7 + $0x30] sm:$0xff]  ;;  %s921_s9 = sshll.u32 %s1380_s30, 4  ;;  %s922_s9 = int_to_ptr.vmem [resolvable:$true] %s921_s9 }
  0x39   :  { %190 = vmatpush1.msra.mxu0 %v128_v7  ;;  %1073 = vmatprep.subr.mxu1 %v1377_v0  ;;  %v120_v22 = vld [vmem:[#allocation7 + $0x28] sm:$0xff]  ;;  %v119_v23 = vld [vmem:[#allocation7 + $0x20] sm:$0xff]  ;;  %v118_v24 = vld [vmem:[#allocation7 + $0x18] sm:$0xff]  ;;  %p1348_p7 = scmp.lt.s32.totalorder %s922_s9, %s922_s9 }
  0x3a   :  { %191 = vmatprep.subr.mxu0 %v1377_v0  ;;  %1074 = vmatpush3.msra.mxu1 %v1472_v18  ;;  %v117_v25 = vld [vmem:[#allocation7 + $0x10] sm:$0xff]  ;;  %v116_v26 = vld [vmem:[#allocation7 + $0x8] sm:$0xff]  ;;  %v115_v27 = vld [vmem:[#allocation7] sm:$0xff] }
  0x3b   :  { %192 = vmatpush1.msra.mxu0 %v127_v8  ;;  %1075 = vmatprep.subr.mxu1 %v1377_v0  ;;  %v138_v28 = vld [vmem:[#allocation7 + $0xb8] sm:$0xff]  ;;  %v137_v29 = vld [vmem:[#allocation7 + $0xb0] sm:$0xff]  ;;  %v136_v30 = vld [vmem:[#allocation7 + $0xa8] sm:$0xff] }
  0x3c   :  { %193 = vmatprep.subr.mxu0 %v1377_v0  ;;  %v135_v31 = vld [vmem:[#allocation7 + $0xa0] sm:$0xff]  ;;  %v134_v32 = vld [vmem:[#allocation7 + $0x98] sm:$0xff]  ;;  %v133_v33 = vld [vmem:[#allocation7 + $0x90] sm:$0xff] }
  0x3d   :  { %v145_v9 = vld [vmem:[#allocation2 + $0x1] sm:$0xff]  ;;  %v146_v12 = vld [vmem:[#allocation2 + $0x9] sm:$0xff]  ;;  %194 = vmatpush1.msra.mxu0 %v126_v11  ;;  %v1511_v53 = vld [vmem:[#allocation10 + $0x58] sm:$0xff] }
  0x3e   :  { %v147_v10 = vld [vmem:[#allocation2 + $0x19] sm:$0xff]  ;;  %157 = vrot.lane.b32.xlu0 %v145_v9, %s1378_s4  ;;  %v148_v13 = vld [vmem:[#allocation2 + $0x21] sm:$0xff]  ;;  %195 = vmatprep.subr.mxu0 %v1377_v0  ;;  %v150_v38 = vld [vmem:[#allocation2 + $0xa] sm:$0xff] }
  0x3f   :  { %161 = vrot.lane.b32.xlu1 %v147_v10, %s1378_s4  ;;  %v149_v14 = vld [vmem:[#allocation2 + $0x2] sm:$0xff]  ;;  %196 = vmatpush1.msra.mxu0 %v125_v15  ;;  %v151_v43 = vld [vmem:[#allocation2 + $0x1a] sm:$0xff]  ;;  %v1515_v54 = vld [vmem:[#allocation10 + $0x50] sm:$0xff] }
  0x40   :  { %935 = vmatprep.mubr.msk.f32.mxu0 %vm110_vm1, %v149_v14  ;;  %197 = vmatprep.subr.mxu0 %v1377_v0  ;;  %v132_v34 = vld [vmem:[#allocation7 + $0x88] sm:$0xff]  ;;  %v131_v35 = vld [vmem:[#allocation7 + $0x80] sm:$0xff]  ;;  %v143_v44 = vld [vmem:[#allocation2 + $0x18] sm:$0xff] }
  0x41   :  { %198 = vmatpush1.msra.mxu0 %v124_v16  ;;  %v141_v36 = vld [vmem:[#allocation2] sm:$0xff]  ;;  %v142_v40 = vld [vmem:[#allocation2 + $0x8] sm:$0xff]  ;;  %v1527_v57 = vld [vmem:[#allocation10 + $0x38] sm:$0xff] }
  0x42   :  { %159 = vrot.lane.b32.xlu0 %v146_v12, %s1378_s4  ;;  %199 = vmatprep.subr.mxu0 %v1377_v0  ;;  %v152_v48 = vld [vmem:[#allocation2 + $0x22] sm:$0xff]  ;;  %v1531_v58 = vld [vmem:[#allocation10 + $0x30] sm:$0xff]  ;;  %v1543_v61 = vld [vmem:[#allocation10 + $0x18] sm:$0xff] }
  0x43   :  { %163 = vrot.lane.b32.xlu1 %v148_v13, %s1378_s4  ;;  %200 = vmatpush1.msra.mxu0 %v123_v19  ;;  %v144_v49 = vld [vmem:[#allocation2 + $0x20] sm:$0xff]  ;;  %v1503_v51 = vld [vmem:[#allocation10 + $0x68] sm:$0xff]  ;;  %v1545_v62 = vld [vmem:[#allocation10 + $0x10] sm:$0xff] }
  0x44   :  { %201 = vmatprep.subr.mxu0 %v1377_v0  ;;  %1076 = vmatpush3.msra.mxu1 %v1503_v51  ;;  %v1507_v52 = vld [vmem:[#allocation10 + $0x60] sm:$0xff]  ;;  %v1519_v55 = vld [vmem:[#allocation10 + $0x48] sm:$0xff] }
  0x45   :  { %202 = vmatpush1.msra.mxu0 %v122_v20  ;;  %1077 = vmatprep.subr.mxu1 %v1377_v0  ;;  %v1523_v56 = vld [vmem:[#allocation10 + $0x40] sm:$0xff]  ;;  %v1535_v59 = vld [vmem:[#allocation10 + $0x28] sm:$0xff] }
  0x46   :  { %203 = vmatprep.subr.mxu0 %v1377_v0  ;;  %1078 = vmatpush3.msra.mxu1 %v1507_v52  ;;  %v1539_v60 = vld [vmem:[#allocation10 + $0x20] sm:$0xff]  ;;  %v1551_v63 = vld [vmem:[#allocation10 + $0x8] sm:$0xff] }
  0x47   :  { %204 = vmatpush1.msra.mxu0 %v121_v21  ;;  %1079 = vmatprep.subr.mxu1 %v1377_v0  ;;  %v1555_v1 = vld [vmem:[#allocation10] sm:$0xff]  ;;  %v350_v21 = vlaneseq }
  0x48   :  { %205 = vmatprep.subr.mxu0 %v1377_v0  ;;  %1080 = vmatpush3.msra.mxu1 %v1511_v53 }
  0x49   :  { %206 = vmatpush1.msra.mxu0 %v120_v22  ;;  %1081 = vmatprep.subr.mxu1 %v1377_v0  ;;  %v351_v22 = vshrl.u32 %v350_v21, 7  ;;  %v520_v21 = vld [vmem:[#allocation9 + $0x148] sm:$0xff] }
  0x4a   :  { %207 = vmatprep.subr.mxu0 %v1377_v0  ;;  %1082 = vmatpush3.msra.mxu1 %v1515_v54 }
  0x4b   :  { %208 = vmatpush1.msra.mxu0 %v119_v23  ;;  %1083 = vmatprep.subr.mxu1 %v1377_v0  ;;  %v1606_v23 = vsub.s32 0, %v351_v22  ;;  %v488_v22 = vld [vmem:[#allocation9 + $0x48] sm:$0xff] }
  0x4c   :  { %209 = vmatprep.subr.mxu0 %v1377_v0  ;;  %1084 = vmatpush3.msra.mxu1 %v1519_v55 }
  0x4d   :  { %210 = vmatpush1.msra.mxu0 %v118_v24  ;;  %1085 = vmatprep.subr.mxu1 %v1377_v0 }
  0x4e   :  { %211 = vmatprep.subr.mxu0 %v1377_v0  ;;  %1086 = vmatpush3.msra.mxu1 %v1523_v56 }
  0x4f   :  { %212 = vmatpush1.msra.mxu0 %v117_v25  ;;  %1087 = vmatprep.subr.mxu1 %v1377_v0 }
  0x50   :  { %213 = vmatprep.subr.mxu0 %v1377_v0  ;;  %1088 = vmatpush3.msra.mxu1 %v1527_v57 }
  0x51   :  { %214 = vmatpush1.msra.mxu0 %v116_v26  ;;  %1089 = vmatprep.subr.mxu1 %v1377_v0 }
  0x52   :  { %215 = vmatprep.subr.mxu0 %v1377_v0  ;;  %1090 = vmatpush3.msra.mxu1 %v1531_v58 }
  0x53   :  { %216 = vmatpush1.msra.mxu0 %v115_v27  ;;  %1091 = vmatprep.subr.mxu1 %v1377_v0 }
  0x54   :  { %233 = vmatprep.subr.mxu0 %v1377_v0  ;;  %1092 = vmatpush3.msra.mxu1 %v1535_v59 }
  0x55   :  { %234 = vmatpush2.msra.mxu0 %v138_v28  ;;  %1093 = vmatprep.subr.mxu1 %v1377_v0 }
  0x56   :  { %235 = vmatprep.subr.mxu0 %v1377_v0  ;;  %1094 = vmatpush3.msra.mxu1 %v1539_v60 }
  0x57   :  { %236 = vmatpush2.msra.mxu0 %v137_v29  ;;  %1095 = vmatprep.subr.mxu1 %v1377_v0 }
  0x58   :  { %237 = vmatprep.subr.mxu0 %v1377_v0  ;;  %1096 = vmatpush3.msra.mxu1 %v1543_v61 }
  0x59   :  { %238 = vmatpush2.msra.mxu0 %v136_v30  ;;  %1097 = vmatprep.subr.mxu1 %v1377_v0 }
  0x5a   :  { %239 = vmatprep.subr.mxu0 %v1377_v0  ;;  %1098 = vmatpush3.msra.mxu1 %v1545_v62 }
  0x5b   :  { %240 = vmatpush2.msra.mxu0 %v135_v31  ;;  %1099 = vmatprep.subr.mxu1 %v1377_v0 }
  0x5c   :  { %241 = vmatprep.subr.mxu0 %v1377_v0  ;;  %1100 = vmatpush3.msra.mxu1 %v1551_v63 }
  0x5d   :  { %242 = vmatpush2.msra.mxu0 %v134_v32  ;;  %1101 = vmatprep.subr.mxu1 %v1377_v0 }
  0x5e   :  { %243 = vmatprep.subr.mxu0 %v1377_v0  ;;  %1102 = vmatpush3.msra.mxu1 %v1555_v1 }
  0x5f   :  { %244 = vmatpush2.msra.mxu0 %v133_v33  ;;  %1106 = vmatprep.subr.mxu1 %v1377_v0 }
  0x60   :  { %245 = vmatprep.subr.mxu0 %v1377_v0 }
  0x61   :  { %246 = vmatpush2.msra.mxu0 %v132_v34 }
  0x62   :  { %247 = vmatprep.subr.mxu0 %v1377_v0 }
  0x63   :  { %248 = vmatpush2.msra.mxu0 %v131_v35 }
  0xb0   :  { %v158_v37 = vpop.permute.xlu0 %157 }
  0xb1   :  { %v169_v39 = vsel %vm110_vm1, %v141_v36, %v158_v37  ;;  %v162_v41 = vpop.permute.xlu1 %161 }
  0xb2   :  { %250 = vmatmul.mubr.f32.vlgmr.msra.gmra.mxu0 %v169_v39  ;;  %v171_v46 = vsel %vm110_vm1, %v143_v44, %v162_v41 }
  0xb3   :  { %936 = vmatprep.mubr.msk.f32.mxu0 %vm110_vm1, %v150_v38 }
  0xb4   :  { %v160_v42 = vpop.permute.xlu0 %159 }
  0xb5   :  { %v170_v45 = vsel %vm110_vm1, %v142_v40, %v160_v42  ;;  %v164_v47 = vpop.permute.xlu1 %163 }
  0xb6   :  { %255 = vmatmul.mubr.f32.gmra.mxu0 %v170_v45  ;;  %v172_v50 = vsel %vm110_vm1, %v144_v49, %v164_v47  ;;  %v510_v45 = vld [vmem:[#allocation9 + $0xf8] sm:$0xff]  ;;  %v525_v49 = vld [vmem:[#allocation9 + $0x170] sm:$0xff] }
  0xb7   :  { %937 = vmatprep.mubr.msk.f32.mxu0 %vm110_vm1, %v151_v43  ;;  %973 = vmatprep.subr.mxu0 %v510_v45  ;;  %v494_v47 = vld [vmem:[#allocation9 + $0x78] sm:$0xff]  ;;  %v481_v45 = vld [vmem:[#allocation9 + $0x10] sm:$0xff] }
  0xb8   :  { %974 = vmatpush3.msra.mxu0 %v494_v47  ;;  %v512_v47 = vld [vmem:[#allocation9 + $0x108] sm:$0xff] }
  0xba   :  { %260 = vmatmul.mubr.f32.gmra.mxu0 %v171_v46  ;;  %v526_v46 = vld [vmem:[#allocation9 + $0x178] sm:$0xff] }
  0xbb   :  { %938 = vmatprep.mubr.msk.f32.mxu0 %vm110_vm1, %v152_v48  ;;  %v509_v48 = vld [vmem:[#allocation9 + $0xf0] sm:$0xff] }
  0xbc   :  { %975 = vmatprep.subr.mxu0 %v509_v48  ;;  %v480_v48 = vld [vmem:[#allocation9 + $0x8] sm:$0xff] }
  0xbe   :  { %265 = vmatmul.mubr.f32.gmra.mxu0 %v172_v50  ;;  %v493_v50 = vld [vmem:[#allocation9 + $0x70] sm:$0xff] }
  0xbf   :  { %976 = vmatpush3.msra.mxu0 %v493_v50  ;;  %v511_v50 = vld [vmem:[#allocation9 + $0x100] sm:$0xff] }
 0x172   :  { %v1561_v2 = vpop.f32.mrf.mxu0 }
 0x174   :  { %v253_v3 = vpop.f32.mrf.mxu0 }
 0x175   :  { %v508_v3 = vld [vmem:[#allocation9 + $0xe8] sm:$0xff] }
 0x176   :  { %v1563_v4 = vpop.f32.mrf.mxu0  ;;  %977 = vmatprep.subr.mxu0 %v508_v3  ;;  %v479_v3 = vld [vmem:[#allocation9] sm:$0xff] }
 0x177   :  { %v270_v7 = vadd.f32 %v1563_v4, %v1561_v2 }
 0x178   :  { %v258_v5 = vpop.f32.mrf.mxu0 }
 0x179   :  { %v524_v5 = vld [vmem:[#allocation9 + $0x168] sm:$0xff] }
 0x17a   :  { %v1565_v6 = vpop.f32.mrf.mxu0 }
 0x17b   :  { %v271_v9 = vadd.f32 %v270_v7, %v1565_v6  ;;  %v492_v7 = vld [vmem:[#allocation9 + $0x68] sm:$0xff] }
 0x17c   :  { %v263_v8 = vpop.f32.mrf.mxu0  ;;  %978 = vmatpush3.msra.mxu0 %v492_v7 }
 0x17d   :  { %v507_v8 = vld [vmem:[#allocation9 + $0xe0] sm:$0xff] }
 0x17e   :  { %v1570_v10 = vpop.f32.mrf.mxu0  ;;  %979 = vmatprep.subr.mxu0 %v507_v8 }
 0x17f   :  { %v272_v11 = vadd.f32 %v271_v9, %v1570_v10  ;;  %v523_v9 = vld [vmem:[#allocation9 + $0x160] sm:$0xff] }
 0x180   :  { %v268_v12 = vpop.f32.mrf.mxu0 }
 0x181   :  { %v273_v13 = vrot.slane %v272_v11, 4  ;;  %v506_v12 = vld [vmem:[#allocation9 + $0xd8] sm:$0xff] }
 0x183   :  { %v274_v14 = vadd.f32 %v273_v13, %v272_v11  ;;  %v491_v11 = vld [vmem:[#allocation9 + $0x60] sm:$0xff]  ;;  %v522_v13 = vld [vmem:[#allocation9 + $0x158] sm:$0xff] }
 0x184   :  { %980 = vmatpush3.msra.mxu0 %v491_v11  ;;  %v139_v11 = vld [vmem:[%s1714_s2] sm:$0x1] }
 0x185   :  { %v275_v15 = vrot.slane %v274_v14, 2  ;;  %981 = vmatprep.subr.mxu0 %v506_v12 }
 0x187   :  { %v276_v16 = vadd.f32 %v275_v15, %v274_v14  ;;  %v490_v14 = vld [vmem:[#allocation9 + $0x58] sm:$0xff]  ;;  %v505_v15 = vld [vmem:[#allocation9 + $0xd0] sm:$0xff] }
 0x188   :  { %982 = vmatpush3.msra.mxu0 %v490_v14  ;;  %v140_v14 = vld [vmem:[%s1715_s3] sm:$0x1] }
 0x189   :  { %v277_v19 = vrot.slane %v276_v16, 1  ;;  %983 = vmatprep.subr.mxu0 %v505_v15 }
 0x18b   :  { %v278_v20 = vadd.f32 %v277_v19, %v276_v16  ;;  %v521_v16 = vld [vmem:[#allocation9 + $0x150] sm:$0xff] }
 0x18c   :  { %v489_v19 = vld [vmem:[#allocation9 + $0x50] sm:$0xff] }
 0x18d   :  { %1104 = vmatmul.mubr.f32.vlgmr.msra.gmra.mxu1 %v278_v20  ;;  %984 = vmatpush3.msra.mxu0 %v489_v19  ;;  %v504_v20 = vld [vmem:[#allocation9 + $0xc8] sm:$0xff] }
 0x18e   :  { %1107 = vmatpush3.msra.mxu1 %v1470_v17  ;;  %1138 = vmatprep.mubr.msk.f32.mxu1 %vm1379_vm2, %v1377_v0 }
 0x18f   :  { %1108 = vmatprep.subr.mxu1 %v1377_v0  ;;  %985 = vmatprep.subr.mxu0 %v504_v20 }
 0x190   :  { %1109 = vmatpush3.msra.mxu1 %v1472_v18  ;;  %986 = vmatpush3.msra.mxu0 %v488_v22 }
 0x191   :  { %1110 = vmatprep.subr.mxu1 %v1377_v0 }
 0x192   :  { %1111 = vmatpush3.msra.mxu1 %v1503_v51 }
 0x193   :  { %1112 = vmatprep.subr.mxu1 %v1377_v0 }
 0x194   :  { %1113 = vmatpush3.msra.mxu1 %v1507_v52 }
 0x195   :  { %1114 = vmatprep.subr.mxu1 %v1377_v0 }
 0x196   :  { %1115 = vmatpush3.msra.mxu1 %v1511_v53 }
 0x197   :  { %1116 = vmatprep.subr.mxu1 %v1377_v0 }
 0x198   :  { %1117 = vmatpush3.msra.mxu1 %v1515_v54 }
 0x199   :  { %1118 = vmatprep.subr.mxu1 %v1377_v0 }
 0x19a   :  { %1119 = vmatpush3.msra.mxu1 %v1519_v55 }
 0x19b   :  { %1120 = vmatprep.subr.mxu1 %v1377_v0 }
 0x19c   :  { %1121 = vmatpush3.msra.mxu1 %v1523_v56 }
 0x19d   :  { %1122 = vmatprep.subr.mxu1 %v1377_v0 }
 0x19e   :  { %1123 = vmatpush3.msra.mxu1 %v1527_v57 }
 0x19f   :  { %1124 = vmatprep.subr.mxu1 %v1377_v0 }
 0x1a0   :  { %1125 = vmatpush3.msra.mxu1 %v1531_v58 }
 0x1a1   :  { %1126 = vmatprep.subr.mxu1 %v1377_v0 }
 0x1a2   :  { %1127 = vmatpush3.msra.mxu1 %v1535_v59 }
 0x1a3   :  { %1128 = vmatprep.subr.mxu1 %v1377_v0 }
 0x1a4   :  { %1129 = vmatpush3.msra.mxu1 %v1539_v60 }
 0x1a5   :  { %1130 = vmatprep.subr.mxu1 %v1377_v0 }
 0x1a6   :  { %1131 = vmatpush3.msra.mxu1 %v1543_v61 }
 0x1a7   :  { %1132 = vmatprep.subr.mxu1 %v1377_v0 }
 0x1a8   :  { %1133 = vmatpush3.msra.mxu1 %v1545_v62 }
 0x1a9   :  { %1134 = vmatprep.subr.mxu1 %v1377_v0 }
 0x1aa   :  { %1135 = vmatpush3.msra.mxu1 %v1551_v63 }
 0x1ab   :  { %1136 = vmatprep.subr.mxu1 %v1377_v0 }
 0x1ac   :  { %1137 = vmatpush3.msra.mxu1 %v1555_v1 }
 0x1ad   :  { %1141 = vmatprep.subr.mxu1 %v526_v46 }
 0x24d   :  { %v345_v24 = vpop.f32.mrf.mxu1 }
 0x24e   :  { %v1608_v25 = vmul.f32 0.001953125, %v345_v24  ;;  %v503_v24 = vld [vmem:[#allocation9 + $0xc0] sm:$0xff] }
 0x24f   :  { %v1105_v26 = vpop.f32.mrf.mxu1  ;;  %987 = vmatprep.subr.mxu0 %v503_v24 }
 0x250   :  { %v353_v27 = vrot.slane %v1608_v25, %v1606_v23  ;;  %v519_v26 = vld [vmem:[#allocation9 + $0x140] sm:$0xff] }
 0x252   :  { %v354_v28 = vsub.f32 %v1561_v2, %v353_v27  ;;  %v355_v29 = vsub.f32 %v1563_v4, %v353_v27  ;;  %v356_v30 = vsub.f32 %v1565_v6, %v353_v27  ;;  %v357_v31 = vsub.f32 %v1570_v10, %v353_v27  ;;  %v487_v27 = vld [vmem:[#allocation9 + $0x40] sm:$0xff] }
 0x253   :  { %988 = vmatpush3.msra.mxu0 %v487_v27 }
 0x254   :  { %v358_v32 = vmul.f32 %v354_v28, %v354_v28  ;;  %v359_v33 = vmul.f32 %v355_v29, %v355_v29  ;;  %v360_v34 = vmul.f32 %v356_v30, %v356_v30  ;;  %v361_v36 = vmul.f32 %v357_v31, %v357_v31  ;;  %v502_v28 = vld [vmem:[#allocation9 + $0xb8] sm:$0xff]  ;;  %v501_v31 = vld [vmem:[#allocation9 + $0xb0] sm:$0xff] }
 0x255   :  { %989 = vmatprep.subr.mxu0 %v502_v28  ;;  %v518_v29 = vld [vmem:[#allocation9 + $0x138] sm:$0xff] }
 0x256   :  { %v362_v35 = vadd.f32 %v359_v33, %v358_v32  ;;  %v486_v30 = vld [vmem:[#allocation9 + $0x38] sm:$0xff]  ;;  %v517_v32 = vld [vmem:[#allocation9 + $0x130] sm:$0xff] }
 0x257   :  { %990 = vmatpush3.msra.mxu0 %v486_v30  ;;  %v485_v33 = vld [vmem:[#allocation9 + $0x30] sm:$0xff] }
 0x258   :  { %v363_v37 = vadd.f32 %v362_v35, %v360_v34  ;;  %991 = vmatprep.subr.mxu0 %v501_v31  ;;  %v500_v34 = vld [vmem:[#allocation9 + $0xa8] sm:$0xff] }
 0x259   :  { %992 = vmatpush3.msra.mxu0 %v485_v33  ;;  %v516_v35 = vld [vmem:[#allocation9 + $0x128] sm:$0xff] }
 0x25a   :  { %v364_v38 = vadd.f32 %v363_v37, %v361_v36  ;;  %993 = vmatprep.subr.mxu0 %v500_v34  ;;  %v484_v36 = vld [vmem:[#allocation9 + $0x28] sm:$0xff]  ;;  %v499_v37 = vld [vmem:[#allocation9 + $0xa0] sm:$0xff] }
 0x25b   :  { %994 = vmatpush3.msra.mxu0 %v484_v36 }
 0x25c   :  { %v365_v39 = vrot.slane %v364_v38, 4  ;;  %995 = vmatprep.subr.mxu0 %v499_v37 }
 0x25e   :  { %v366_v40 = vadd.f32 %v365_v39, %v364_v38  ;;  %v515_v38 = vld [vmem:[#allocation9 + $0x120] sm:$0xff] }
 0x25f   :  { %v483_v39 = vld [vmem:[#allocation9 + $0x20] sm:$0xff] }
 0x260   :  { %v367_v41 = vrot.slane %v366_v40, 2  ;;  %996 = vmatpush3.msra.mxu0 %v483_v39 }
 0x262   :  { %v368_v42 = vadd.f32 %v367_v41, %v366_v40  ;;  %v498_v40 = vld [vmem:[#allocation9 + $0x98] sm:$0xff] }
 0x263   :  { %v514_v41 = vld [vmem:[#allocation9 + $0x118] sm:$0xff]  ;;  %997 = vmatprep.subr.mxu0 %v498_v40 }
 0x264   :  { %v369_v43 = vrot.slane %v368_v42, 1 }
 0x266   :  { %v370_v44 = vadd.f32 %v369_v43, %v368_v42  ;;  %v482_v42 = vld [vmem:[#allocation9 + $0x18] sm:$0xff]  ;;  %v497_v43 = vld [vmem:[#allocation9 + $0x90] sm:$0xff] }
 0x267   :  { %998 = vmatpush3.msra.mxu0 %v482_v42 }
 0x268   :  { %1139 = vmatmul.mubr.f32.vlgmr.msra.gmra.mxu1 %v370_v44  ;;  %v513_v44 = vld [vmem:[#allocation9 + $0x110] sm:$0xff]  ;;  %999 = vmatprep.subr.mxu0 %v497_v43 }
 0x269   :  { %1142 = vmatpush3.msra.mxu1 %v526_v46  ;;  %v496_v46 = vld [vmem:[#allocation9 + $0x88] sm:$0xff]  ;;  %1000 = vmatpush3.msra.mxu0 %v481_v45 }
 0x26a   :  { %1143 = vmatprep.subr.mxu1 %v525_v49  ;;  %1001 = vmatprep.subr.mxu0 %v496_v46 }
 0x26b   :  { %1144 = vmatpush3.msra.mxu1 %v525_v49  ;;  %v495_v49 = vld [vmem:[#allocation9 + $0x80] sm:$0xff]  ;;  %1002 = vmatpush3.msra.mxu0 %v480_v48 }
 0x26c   :  { %1145 = vmatprep.subr.mxu1 %v524_v5  ;;  %1003 = vmatprep.subr.mxu0 %v495_v49 }
 0x26d   :  { %1146 = vmatpush3.msra.mxu1 %v524_v5  ;;  %1004 = vmatpush3.msra.mxu0 %v479_v3 }
 0x26e   :  { %1147 = vmatprep.subr.mxu1 %v523_v9  ;;  %1179 = vmatprep.subr.mxu0 %v1377_v0 }
 0x26f   :  { %1148 = vmatpush3.msra.mxu1 %v523_v9 }
 0x270   :  { %1149 = vmatprep.subr.mxu1 %v522_v13 }
 0x271   :  { %1150 = vmatpush3.msra.mxu1 %v522_v13 }
 0x272   :  { %1151 = vmatprep.subr.mxu1 %v521_v16 }
 0x273   :  { %1152 = vmatpush3.msra.mxu1 %v521_v16 }
 0x274   :  { %1153 = vmatprep.subr.mxu1 %v520_v21 }
 0x275   :  { %1154 = vmatpush3.msra.mxu1 %v520_v21 }
 0x276   :  { %1155 = vmatprep.subr.mxu1 %v519_v26 }
 0x277   :  { %1156 = vmatpush3.msra.mxu1 %v519_v26 }
 0x278   :  { %1157 = vmatprep.subr.mxu1 %v518_v29 }
 0x279   :  { %1158 = vmatpush3.msra.mxu1 %v518_v29 }
 0x27a   :  { %1159 = vmatprep.subr.mxu1 %v517_v32 }
 0x27b   :  { %1160 = vmatpush3.msra.mxu1 %v517_v32 }
 0x27c   :  { %1161 = vmatprep.subr.mxu1 %v516_v35 }
 0x27d   :  { %1162 = vmatpush3.msra.mxu1 %v516_v35 }
 0x27e   :  { %1163 = vmatprep.subr.mxu1 %v515_v38 }
 0x27f   :  { %1164 = vmatpush3.msra.mxu1 %v515_v38 }
 0x280   :  { %1165 = vmatprep.subr.mxu1 %v514_v41 }
 0x281   :  { %1166 = vmatpush3.msra.mxu1 %v514_v41 }
 0x282   :  { %1167 = vmatprep.subr.mxu1 %v513_v44 }
 0x283   :  { %1168 = vmatpush3.msra.mxu1 %v513_v44 }
 0x284   :  { %1169 = vmatprep.subr.mxu1 %v512_v47 }
 0x285   :  { %1170 = vmatpush3.msra.mxu1 %v512_v47 }
 0x286   :  { %1171 = vmatprep.subr.mxu1 %v511_v50 }
 0x287   :  { %1172 = vmatpush3.msra.mxu1 %v511_v50 }
 0x288   :  { %1214 = vmatprep.subr.mxu1 %v1377_v0 }
 0x328   :  { %v437_v5 = vpop.f32.mrf.mxu1 }
 0x329   :  { %v441_v7 = vmul.f32 0.001953125, %v437_v5 }
 0x32a   :  { %v1140_v8 = vpop.f32.mrf.mxu1 }
 0x32b   :  { %v442_v9 = vadd.f32 1e-05, %v441_v7 }
 0x32d   :  { %1259 = vrsqrt.f32 %v442_v9 }
 0x33a   :  { %v1260_v12 = vpop.eup %1259 }
 0x33b   :  { %v444_v13 = vmul.f32 %v1260_v12, %v139_v11 }
 0x33d   :  { %v445_v15 = vmul.f32 %v444_v13, %v1608_v25  ;;  %v451_v16 = vrot.slane %v444_v13, %v1606_v23 }
 0x33f   :  { %v446_v19 = vsub.f32 %v140_v14, %v445_v15  ;;  %v453_v20 = vmul.f32 %v451_v16, %v1561_v2  ;;  %v454_v21 = vmul.f32 %v451_v16, %v1563_v4  ;;  %v455_v22 = vmul.f32 %v451_v16, %v1565_v6 }
 0x340   :  { %v456_v24 = vmul.f32 %v451_v16, %v1570_v10 }
 0x341   :  { %v461_v26 = vrot.slane %v446_v19, %v1606_v23 }
 0x343   :  { %v463_v27 = vadd.f32 %v461_v26, %v453_v20  ;;  %v464_v28 = vadd.f32 %v461_v26, %v454_v21  ;;  %v465_v29 = vadd.f32 %v461_v26, %v455_v22  ;;  %v466_v30 = vadd.f32 %v461_v26, %v456_v24 }
 0x345   :  { %v467_v31 = vmax.f32 %v463_v27, 0.0  ;;  %v468_v32 = vmax.f32 %v464_v28, 0.0  ;;  %v469_v25 = vmax.f32 %v465_v29, 0.0  ;;  %v470_v33 = vmax.f32 %v466_v30, 0.0 }
 0x347   :  { %475 = vst [vmem:[#allocation3 + $0x1] sm:$0xff] %v467_v31  ;;  %476 = vst [vmem:[#allocation3 + $0x9] sm:$0xff] %v468_v32  ;;  %605 = vmatprep.mubr.f32.mxu0 %v467_v31 }
 0x348   :  { %477 = vst [vmem:[#allocation3 + $0x19] sm:$0xff] %v469_v25  ;;  %478 = vst [vmem:[#allocation3 + $0x21] sm:$0xff] %v470_v33 }
 0x34e   :  { %v537_v2 = vld [vmem:[#allocation3 + $0x2] sm:$0xff]  ;;  %v538_v6 = vld [vmem:[#allocation3 + $0xa] sm:$0xff] }
 0x34f   :  { %v529_v4 = vld [vmem:[#allocation3] sm:$0xff]  ;;  %1173 = vmatprep.mubr.f32.mxu1 %v537_v2  ;;  %v530_v34 = vld [vmem:[#allocation3 + $0x8] sm:$0xff]  ;;  %v531_v36 = vld [vmem:[#allocation3 + $0x18] sm:$0xff] }
 0x350   :  { %606 = vmatmul.mubr.f32.vlgmr.msra.gmra.mxu0 %v529_v4  ;;  %1174 = vmatmul.mubr.f32.vlgmr.msra.gmra.mxu1 %v538_v6  ;;  %v539_v10 = vld [vmem:[#allocation3 + $0x1a] sm:$0xff]  ;;  %v540_v35 = vld [vmem:[#allocation3 + $0x22] sm:$0xff]  ;;  %v528_v6 = vld [vmem:[%s1718_s6] sm:$0x1] }
 0x351   :  { %610 = vmatprep.mubr.f32.mxu0 %v468_v32  ;;  %1176 = vmatprep.mubr.f32.mxu1 %v539_v10 }
 0x352   :  { %1180 = vmatpush3.msra.mxu0 %v1470_v17  ;;  %1215 = vmatpush3.msra.mxu1 %v1470_v17  ;;  %v532_v17 = vld [vmem:[#allocation3 + $0x20] sm:$0xff] }
 0x353   :  { %1181 = vmatprep.subr.mxu0 %v1377_v0  ;;  %1216 = vmatprep.subr.mxu1 %v1377_v0 }
 0x354   :  { %611 = vmatmul.mubr.f32.gmra.mxu0 %v530_v34  ;;  %1177 = vmatmul.mubr.f32.gmra.mxu1 %v540_v35 }
 0x355   :  { %615 = vmatprep.mubr.f32.mxu0 %v469_v25  ;;  %1182 = vmatpush3.msra.mxu0 %v1472_v18 }
 0x356   :  { %1217 = vmatpush3.msra.mxu1 %v1472_v18  ;;  %1183 = vmatprep.subr.mxu0 %v1377_v0 }
 0x357   :  { %1218 = vmatprep.subr.mxu1 %v1377_v0  ;;  %1184 = vmatpush3.msra.mxu0 %v1503_v51 }
 0x358   :  { %616 = vmatmul.mubr.f32.gmra.mxu0 %v531_v36  ;;  %1219 = vmatpush3.msra.mxu1 %v1503_v51 }
 0x359   :  { %620 = vmatprep.mubr.f32.mxu0 %v470_v33  ;;  %1185 = vmatprep.subr.mxu0 %v1377_v0  ;;  %v527_v33 = vld [vmem:[%s1717_s5] sm:$0x1]  ;;  %s1343_s5 = scalar_lea.vmem %s922_s9, 512 }
 0x35a   :  { %1220 = vmatprep.subr.mxu1 %v1377_v0  ;;  %1186 = vmatpush3.msra.mxu0 %v1507_v52  ;;  %p1344_p6 = scmp.ne.s32.totalorder %s922_s9, %s1343_s5  ;;  %p1349_p8 = scmp.lt.s32.totalorder %s1343_s5, %s1343_s5 }
 0x35b   :  { %1221 = vmatpush3.msra.mxu1 %v1507_v52  ;;  %1187 = vmatprep.subr.mxu0 %v1377_v0 }
 0x35c   :  { %621 = vmatmul.mubr.f32.gmra.mxu0 %v532_v17  ;;  %1222 = vmatprep.subr.mxu1 %v1377_v0  ;;  %p1350_p9 = por %p1349_p8, %p1348_p7 }
 0x35d   :  { %1188 = vmatpush3.msra.mxu0 %v1511_v53  ;;  %1211 = vmatprep.mubr.msk.f32.mxu0 %vm1379_vm2, %v1377_v0 }
 0x35e   :  { %1189 = vmatprep.subr.mxu0 %v1377_v0  ;;  %1223 = vmatpush3.msra.mxu1 %v1511_v53  ;;  %p1351_p10 = pnand %p1350_p9, %p1344_p6 }
 0x35f   :  { %1190 = vmatpush3.msra.mxu0 %v1515_v54  ;;  %1224 = vmatprep.subr.mxu1 %v1377_v0 }
 0x360   :  { %1191 = vmatprep.subr.mxu0 %v1377_v0  ;;  %1225 = vmatpush3.msra.mxu1 %v1515_v54 }
 0x361   :  { %1192 = vmatpush3.msra.mxu0 %v1519_v55  ;;  %1226 = vmatprep.subr.mxu1 %v1377_v0 }
 0x362   :  { %1193 = vmatprep.subr.mxu0 %v1377_v0  ;;  %1227 = vmatpush3.msra.mxu1 %v1519_v55 }
 0x363   :  { %1194 = vmatpush3.msra.mxu0 %v1523_v56  ;;  %1228 = vmatprep.subr.mxu1 %v1377_v0 }
 0x364   :  { %1195 = vmatprep.subr.mxu0 %v1377_v0  ;;  %1229 = vmatpush3.msra.mxu1 %v1523_v56 }
 0x365   :  { %1196 = vmatpush3.msra.mxu0 %v1527_v57  ;;  %1230 = vmatprep.subr.mxu1 %v1377_v0 }
 0x366   :  { %1197 = vmatprep.subr.mxu0 %v1377_v0  ;;  %1231 = vmatpush3.msra.mxu1 %v1527_v57 }
 0x367   :  { %1198 = vmatpush3.msra.mxu0 %v1531_v58  ;;  %1232 = vmatprep.subr.mxu1 %v1377_v0 }
 0x368   :  { %1199 = vmatprep.subr.mxu0 %v1377_v0  ;;  %1233 = vmatpush3.msra.mxu1 %v1531_v58 }
 0x369   :  { %1200 = vmatpush3.msra.mxu0 %v1535_v59  ;;  %1234 = vmatprep.subr.mxu1 %v1377_v0 }
 0x36a   :  { %1201 = vmatprep.subr.mxu0 %v1377_v0  ;;  %1235 = vmatpush3.msra.mxu1 %v1535_v59 }
 0x36b   :  { %1202 = vmatpush3.msra.mxu0 %v1539_v60  ;;  %1236 = vmatprep.subr.mxu1 %v1377_v0 }
 0x36c   :  { %1203 = vmatprep.subr.mxu0 %v1377_v0  ;;  %1237 = vmatpush3.msra.mxu1 %v1539_v60 }
 0x36d   :  { %1204 = vmatpush3.msra.mxu0 %v1543_v61  ;;  %1238 = vmatprep.subr.mxu1 %v1377_v0 }
 0x36e   :  { %1205 = vmatprep.subr.mxu0 %v1377_v0  ;;  %1239 = vmatpush3.msra.mxu1 %v1543_v61 }
 0x36f   :  { %1206 = vmatpush3.msra.mxu0 %v1545_v62  ;;  %1240 = vmatprep.subr.mxu1 %v1377_v0 }
 0x370   :  { %1207 = vmatprep.subr.mxu0 %v1377_v0  ;;  %1241 = vmatpush3.msra.mxu1 %v1545_v62 }
 0x371   :  { %1208 = vmatpush3.msra.mxu0 %v1551_v63  ;;  %1242 = vmatprep.subr.mxu1 %v1377_v0 }
 0x372   :  { %1209 = vmatprep.subr.mxu0 %v1377_v0  ;;  %1243 = vmatpush3.msra.mxu1 %v1551_v63 }
 0x373   :  { %1210 = vmatpush3.msra.mxu0 %v1555_v1  ;;  %1244 = vmatprep.subr.mxu1 %v1377_v0 }
 0x374   :  { %1246 = vmatprep.mubr.msk.f32.mxu1 %vm1379_vm2, %v1377_v0  ;;  %1245 = vmatpush3.msra.mxu1 %v1555_v1 }
 0x410   :  { %v1005_v18 = vpop.f32.mrf.mxu0  ;;  %v1175_v51 = vpop.f32.mrf.mxu1 }
 0x412   :  { %v1006_v52 = vpop.f32.mrf.mxu0  ;;  %v692_v53 = vpop.f32.mrf.mxu1 }
 0x413   :  { %v1007_v59 = vadd.f32 %v1006_v52, %v1005_v18 }
 0x414   :  { %v1008_v54 = vpop.f32.mrf.mxu0  ;;  %v1178_v57 = vpop.f32.mrf.mxu1 }
 0x415   :  { %v693_v38 = vadd.f32 %v1007_v59, %v692_v53 }
 0x416   :  { %v1009_v55 = vpop.f32.mrf.mxu0  ;;  %v702_v63 = vpop.f32.mrf.mxu1 }
 0x417   :  { %v1010_v56 = vadd.f32 %v1009_v55, %v1008_v54 }
 0x418   :  { %v1011_v58 = vpop.f32.mrf.mxu0 }
 0x419   :  { %v698_v61 = vadd.f32 %v1175_v51, %v1010_v56 }
 0x41a   :  { %v1012_v60 = vpop.f32.mrf.mxu0 }
 0x41b   :  { %v1013_v62 = vadd.f32 %v1012_v60, %v1011_v58  ;;  %v711_v40 = vadd.f32 %v698_v61, %v693_v38 }
 0x41c   :  { %v1014_v37 = vpop.f32.mrf.mxu0 }
 0x41d   :  { %v703_v39 = vadd.f32 %v1013_v62, %v702_v63 }
 0x41e   :  { %v1015_v0 = vpop.f32.mrf.mxu0 }
 0x41f   :  { %v1016_v1 = vadd.f32 %v1015_v0, %v1014_v37  ;;  %v712_v41 = vadd.f32 %v711_v40, %v703_v39 }
 0x421   :  { %v708_v42 = vadd.f32 %v1178_v57, %v1016_v1 }
 0x423   :  { %v713_v43 = vadd.f32 %v712_v41, %v708_v42 }
 0x425   :  { %v714_v44 = vrot.slane %v713_v43, 4 }
 0x427   :  { %v715_v45 = vadd.f32 %v714_v44, %v713_v43 }
 0x429   :  { %v716_v46 = vrot.slane %v715_v45, 2 }
 0x42b   :  { %v717_v47 = vadd.f32 %v716_v46, %v715_v45 }
 0x42d   :  { %v718_v48 = vrot.slane %v717_v47, 1 }
 0x42f   :  { %v719_v49 = vadd.f32 %v718_v48, %v717_v47 }
 0x431   :  { %1212 = vmatmul.mubr.f32.vlgmr.msra.gmra.mxu0 %v719_v49 }
 0x4f1   :  { %v786_v50 = vpop.f32.mrf.mxu0 }
 0x4f2   :  { %v790_v3 = vmul.f32 0.001953125, %v786_v50 }
 0x4f3   :  { %v1213_v5 = vpop.f32.mrf.mxu0 }
 0x4f4   :  { %v794_v7 = vrot.slane %v790_v3, %v1606_v23 }
 0x4f6   :  { %v795_v8 = vsub.f32 %v693_v38, %v794_v7  ;;  %v796_v9 = vsub.f32 %v698_v61, %v794_v7  ;;  %v797_v11 = vsub.f32 %v703_v39, %v794_v7  ;;  %v798_v12 = vsub.f32 %v708_v42, %v794_v7 }
 0x4f8   :  { %v799_v13 = vmul.f32 %v795_v8, %v795_v8  ;;  %v800_v14 = vmul.f32 %v796_v9, %v796_v9  ;;  %v801_v15 = vmul.f32 %v797_v11, %v797_v11  ;;  %v802_v19 = vmul.f32 %v798_v12, %v798_v12 }
 0x4fa   :  { %v803_v16 = vadd.f32 %v800_v14, %v799_v13 }
 0x4fc   :  { %v804_v20 = vadd.f32 %v803_v16, %v801_v15 }
 0x4fe   :  { %v805_v21 = vadd.f32 %v804_v20, %v802_v19 }
 0x500   :  { %v806_v22 = vrot.slane %v805_v21, 4 }
 0x502   :  { %v807_v24 = vadd.f32 %v806_v22, %v805_v21 }
 0x504   :  { %v808_v26 = vrot.slane %v807_v24, 2 }
 0x506   :  { %v809_v27 = vadd.f32 %v808_v26, %v807_v24 }
 0x508   :  { %v810_v28 = vrot.slane %v809_v27, 1 }
 0x50a   :  { %v811_v29 = vadd.f32 %v810_v28, %v809_v27 }
 0x50c   :  { %1247 = vmatmul.mubr.f32.vlgmr.msra.gmra.mxu1 %v811_v29 }
 0x5cc   :  { %v878_v30 = vpop.f32.mrf.mxu1 }
 0x5cd   :  { %v882_v31 = vmul.f32 0.001953125, %v878_v30 }
 0x5ce   :  { %v1248_v32 = vpop.f32.mrf.mxu1 }
 0x5cf   :  { %v883_v25 = vadd.f32 1e-05, %v882_v31 }
 0x5d1   :  { %1261 = vrsqrt.f32 %v883_v25 }
 0x5de   :  { %v1262_v2 = vpop.eup %1261 }
 0x5df   :  { %v885_v4 = vmul.f32 %v1262_v2, %v527_v33 }
 0x5e1   :  { %v886_v10 = vmul.f32 %v885_v4, %v790_v3  ;;  %v892_v34 = vrot.slane %v885_v4, %v1606_v23 }
 0x5e3   :  { %v887_v35 = vsub.f32 %v528_v6, %v886_v10  ;;  %v894_v36 = vmul.f32 %v892_v34, %v693_v38  ;;  %v895_v17 = vmul.f32 %v892_v34, %v698_v61  ;;  %v896_v18 = vmul.f32 %v892_v34, %v703_v39 }
 0x5e4   :  { %v897_v51 = vmul.f32 %v892_v34, %v708_v42 }
 0x5e5   :  { %v902_v52 = vrot.slane %v887_v35, %v1606_v23 }
 0x5e7   :  { %v904_v53 = vadd.f32 %v902_v52, %v894_v36  ;;  %v905_v54 = vadd.f32 %v902_v52, %v895_v17  ;;  %v906_v55 = vadd.f32 %v902_v52, %v896_v18  ;;  %v907_v56 = vadd.f32 %v902_v52, %v897_v51 }
 0x5e9   :  { %v908_v57 = vmax.f32 %v904_v53, 0.0  ;;  %v909_v58 = vmax.f32 %v905_v54, 0.0  ;;  %v910_v59 = vmax.f32 %v906_v55, 0.0  ;;  %v911_v60 = vmax.f32 %v907_v56, 0.0 }
 0x5eb   :  { %912 = vst [vmem:[#allocation12] sm:$0xff] %v908_v57  ;;  %913 = vst [vmem:[#allocation12 + $0x8] sm:$0xff] %v909_v58 }
 0x5ec   :  { %914 = vst [vmem:[#allocation12 + $0x10] sm:$0xff] %v910_v59  ;;  %915 = vst [vmem:[#allocation12 + $0x18] sm:$0xff] %v911_v60 }
 0x5ed   :  { %1354 = shalt.err (!%p1351_p10)
}
 0x5ee   :  { %927 = dma.vmem_to_hbm [thread:$0]  %s922_s9, 512, %s1720_s8, [#allocation6], %s1373_s10, %s1373_s10, %s1374_s11  }
 0x5ef   :  { %1369 = dma.done.wait [#allocation6], 512  }
 0x5f0   :  { %1370 = vsyncadd [#allocation6], 4294966784 }
 0x5f1   :  { %931 = vsyncpa [#allocation5], 1 }
 0x5f2   :  { %932 = vsyncpa [#allocation8], 1 }
 0x5f3   :  { %933 = vsyncpa [#allocation11], 1 }
 0x5f4   :  { %934 = vsyncpa [#allocation6], 1 }

</bundles_post_ra>
